<compile_context>
chip_gen: v5e
topology: v5e:2x2
jax: 0.10.0
libtpu: 0.0.40
codegen_flags: <defaults>
</compile_context>

<pallas_src>
import functools

import jax
import jax.numpy as jnp
from jax import lax
from jax.experimental import pallas as pl
from jax.experimental.pallas import tpu as pltpu


def _selective_group_kernel(x_ref, mask_ref, w1_ref, b1_ref, w2_ref, b2_ref,
                            out_ref, corr_ref, *, hidden):
    x = x_ref[...]                       # (B, D)   f32 (correlation needs f32)
    mask = mask_ref[...]                 # (GB, D)  f32, exactly {0, 1}
    gb = mask.shape[0]
    gbh = w1_ref.shape[1]                # GB * H

    # ---- group-id structure, built in-kernel (no extra HBM streams) ---------------
    # eq[g, c] == True  iff  hidden column c belongs to group g   (no int division).
    col_ids = lax.broadcasted_iota(jnp.int32, (gb, gbh), 1)
    row_ids = lax.broadcasted_iota(jnp.int32, (gb, gbh), 0)
    eq = jnp.logical_and(col_ids >= row_ids * hidden,
                         col_ids < (row_ids + 1) * hidden)
    eq_f = eq.astype(jnp.float32)                                   # (GB, GBH) 0/1

    # ---- layer 1: (x * m_g) @ W1_g for all groups == x @ (mask-replica * W1-slab) --
    # mask replica mrep[d, g*H+k] = mask[g, d]; tiny transpose + 0/1 matmul (exact).
    mrep = jnp.dot(mask.T, eq_f, preferred_element_type=jnp.float32)  # (D, GBH)
    w1m = w1_ref[...] * mrep.astype(jnp.bfloat16)                     # bf16 fold (exact mask)
    h = jnp.dot(x.astype(jnp.bfloat16), w1m,
                preferred_element_type=jnp.float32) + b1_ref[...]     # (B, GBH) f32
    h = jnp.maximum(h, 0.0)

    # ---- layer 2: grouped H-lane reduction against w2 (block-diag never streamed) --
    hw = h * w2_ref[...]                                              # (B, GBH) f32
    out = lax.dot_general(eq_f, hw, (((1,), (1,)), ((), ())),
                          preferred_element_type=jnp.float32)         # (GB, B)
    out_ref[...] = out + b2_ref[...]                                  # lane dim = batch

    # ---- group correlations: closed-form upper-triangular Gram sum (all f32) -------
    # Reference: normed = F.normalize(masked_x[:, nonzero], dim=0)
    #            corr   = triu(normed.T @ normed / B, 1).sum() / (n*(n-1)/2 + 1e-6)
    batch = float(x.shape[0])
    xsq = jnp.sum(x * x, axis=0, keepdims=True)                       # (1, D)
    col_sq = mask * xsq                                               # (GB, D)
    nz = (col_sq > 0.0).astype(jnp.float32)                           # dropped columns -> 0
    n_nz = jnp.sum(nz, axis=-1, keepdims=True)                        # (GB, 1)
    inv_norm = nz * lax.rsqrt(jnp.maximum(col_sq, 1e-30))             # EUP rsqrt, 0 on drops
    diag_sum = jnp.sum(xsq * inv_norm * inv_norm, axis=-1, keepdims=True)
    r = lax.dot_general(inv_norm, x, (((1,), (1,)), ((), ())),
                        preferred_element_type=jnp.float32)           # (GB, B)
    full_sum = jnp.sum(r * r, axis=-1, keepdims=True)                 # (GB, 1)
    upper_sum = 0.5 * (full_sum - diag_sum)                           # sum_{i<j} Gram_ij
    denom = 0.5 * n_nz * (n_nz - 1.0) + 1e-6
    corr = (upper_sum / batch) / denom
    corr_ref[...] = jnp.where(n_nz >= 2.0, corr, 0.0)                 # <2 columns -> 0.0


def prepare_params(W1, b1, W2, b2):
    """Mask-independent parameter plumbing, hoisted out of the per-forward hot path.

    W1: (G, D, H), b1: (G, H), W2: (G, H, 1), b2: (G, 1).
    """
    G, D, H = W1.shape
    # Column g*H + k of the slab is W1[g, :, k]  (bf16: halves the dominant DMA).
    w1_slab = jnp.transpose(W1, (1, 0, 2)).reshape(D, G * H).astype(jnp.bfloat16)
    b1_row = b1.reshape(1, G * H).astype(jnp.float32)
    w2_row = W2.reshape(1, G * H).astype(jnp.float32)
    b2_col = b2.reshape(G, 1).astype(jnp.float32)
    return dict(w1_slab=w1_slab, b1_row=b1_row, w2_row=w2_row, b2_col=b2_col,
                num_groups=G, input_dim=D, hidden=H)


def _step_vmem_bytes(B, D, H, gb):
    """Rough per-grid-step VMEM footprint (double-buffered I/O + main intermediates)."""
    gbh = gb * H
    io = 2 * (B * D * 4 + gb * D * 4 + D * gbh * 2 + 2 * gbh * 4
              + gb * 4 + gb * B * 4 + gb * 4)
    work = (2 * D * gbh * 2 + B * D * 2 + 2 * B * gbh * 4
            + 2 * gb * gbh * 4 + 4 * gb * D * 4 + 2 * gb * B * 4)
    return io + work


def _pick_group_block(G, H, D, B, budget_bytes=20 * 1024 * 1024):
    """Largest valid group block that fits the VMEM budget; prefer >= 2 grid steps
    (pipelining + megacore) when the W1 stream is large enough to matter."""
    cands = [gb for gb in range(G, 0, -1)
             if G % gb == 0 and (gb == G or (gb % 8 == 0 and (gb * H) % 128 == 0))]
    fitting = [gb for gb in cands if _step_vmem_bytes(B, D, H, gb) <= budget_bytes]
    if not fitting:
        return cands[-1]
    if D * G * H * 2 >= (2 << 20):        # weight stream big enough to pipeline / split
        multi = [gb for gb in fitting if gb <= G // 2]
        if multi:
            return multi[0]
    return fitting[0]


def selective_group_forward(x, mask, params, *, group_block=None):
    """x: (B, D); mask: (G, D) in {0,1}. Returns (out (B, G), correlations (G,))."""
    B, D = x.shape
    G, H = params["num_groups"], params["hidden"]
    assert mask.shape == (G, D) and params["input_dim"] == D

    GB = _pick_group_block(G, H, D, B) if group_block is None else group_block
    if G % GB != 0:
        raise ValueError("group_block must divide num_groups")
    if GB != G and (GB % 8 != 0 or (GB * H) % 128 != 0):
        raise ValueError("multi-block tiling needs group_block % 8 == 0 and "
                         "group_block * hidden % 128 == 0 (TPU (8,128) block rule)")
    n_blk = G // GB

    # TODO(synk): the batch stays fully resident per step because the correlation's
    # column normalization is a full-batch reduction (a batch-tiled variant needs a
    # two-pass / Gram-accumulation scheme); only the group axis is tiled here.
    out_gb, corr = pl.pallas_call(
        functools.partial(_selective_group_kernel, hidden=H),
        out_shape=(
            jax.ShapeDtypeStruct((G, B), jnp.float32),   # (G, B): lane-dense batch stores
            jax.ShapeDtypeStruct((G, 1), jnp.float32),
        ),
        grid_spec=pltpu.PrefetchScalarGridSpec(
            num_scalar_prefetch=0,
            grid=(n_blk,),
            in_specs=[
                pl.BlockSpec((B, D), lambda i: (0, 0)),          # x (fetched once, reused)
                pl.BlockSpec((GB, D), lambda i: (i, 0)),         # mask rows of this block
                pl.BlockSpec((D, GB * H), lambda i: (0, i)),     # bf16 W1 slab (dominant DMA)
                pl.BlockSpec((1, GB * H), lambda i: (0, i)),     # b1
                pl.BlockSpec((1, GB * H), lambda i: (0, i)),     # w2 (flattened per column)
                pl.BlockSpec((GB, 1), lambda i: (i, 0)),         # b2
            ],
            out_specs=(
                pl.BlockSpec((GB, B), lambda i: (i, 0)),
                pl.BlockSpec((GB, 1), lambda i: (i, 0)),
            ),
        ),
        compiler_params=pltpu.CompilerParams(
            dimension_semantics=("parallel",),
            vmem_limit_bytes=48 * 1024 * 1024),
    )(x.astype(jnp.float32), mask.astype(jnp.float32),
      params["w1_slab"], params["b1_row"], params["w2_row"], params["b2_col"])

    return out_gb.T, corr[:, 0]


def gumbel_topk_mask(group_logits, group_size, temperature, key):
    """CorrelatedGroupSelector mask: Gumbel noise + softmax + top-k scatter (JAX glue)."""
    u = jax.random.uniform(key, group_logits.shape,
                           minval=1e-9, maxval=1.0, dtype=group_logits.dtype)
    gumbel = -jnp.log(-jnp.log(u))
    probs = jax.nn.softmax((group_logits + gumbel) / temperature, axis=-1)
    _, idx = lax.top_k(probs, group_size)
    G = group_logits.shape[0]
    mask = jnp.zeros_like(probs)
    mask = mask.at[jnp.arange(G)[:, None], idx].set(1.0)
    return mask


def _reference_forward(x, mask, W1, b1, W2, b2):
    """Pure-JAX f32 reference matching the PyTorch forward (correctness check)."""
    B = x.shape[0]
    G = mask.shape[0]
    hi = lax.Precision.HIGHEST
    outs, corrs = [], []
    for g in range(G):
        gx = x * mask[g]
        h = jnp.maximum(jnp.dot(gx, W1[g], precision=hi) + b1[g], 0.0)
        outs.append(jnp.dot(h, W2[g], precision=hi) + b2[g])
        nzc = jnp.sum(jnp.abs(gx), axis=0) > 0
        norm = jnp.sqrt(jnp.sum(gx * gx, axis=0))
        normed = jnp.where(nzc[None, :], gx / jnp.maximum(norm, 1e-12)[None, :], 0.0)
        gram = jnp.dot(normed.T, normed, precision=hi) / B
        upper = jnp.sum(jnp.triu(gram, k=1))
        n = jnp.sum(nzc.astype(jnp.float32))
        corrs.append(jnp.where(n >= 2.0, upper / (n * (n - 1.0) / 2.0 + 1e-6), 0.0))
    return jnp.concatenate(outs, axis=1), jnp.stack(corrs)


def _run_case(base_key, case_id, B, D, G, GS, H, group_block=None):
    key = jax.random.fold_in(base_key, case_id)
    k_x, k_logits, k_w1, k_b1, k_w2, k_b2, k_g = jax.random.split(key, 7)
    x = jax.random.normal(k_x, (B, D), dtype=jnp.float32)
    group_logits = jax.random.normal(k_logits, (G, D), dtype=jnp.float32)
    # Per-group MLP params: Linear(D, H=16) -> ReLU -> Linear(H, 1).
    W1 = jax.random.normal(k_w1, (G, D, H), dtype=jnp.float32) / jnp.sqrt(jnp.float32(D))
    b1 = jax.random.normal(k_b1, (G, H), dtype=jnp.float32) * 0.01
    W2 = jax.random.normal(k_w2, (G, H, 1), dtype=jnp.float32) / jnp.sqrt(jnp.float32(H))
    b2 = jax.random.normal(k_b2, (G, 1), dtype=jnp.float32) * 0.01
    mask = gumbel_topk_mask(group_logits, GS, 1.0, k_g)

    params = prepare_params(W1, b1, W2, b2)          # hoisted, mask-independent plumbing
    out, corr = selective_group_forward(x, mask, params, group_block=group_block)
    jax.block_until_ready((out, corr))

    # TODO(synk): torch.topk(-correlations, 2) only gates grad flow (no_grad branches);
    # it does not change forward values, so it is intentionally not reproduced here.
    out_ref, corr_ref = _reference_forward(x, mask, W1, b1, W2, b2)
    assert out.shape == (B, G) and corr.shape == (G,)
    out_err = float(jnp.max(jnp.abs(out - out_ref)))
    corr_err = float(jnp.max(jnp.abs(corr - corr_ref)))
    # Layer-1 runs in bf16 (f32 accumulation) -> small error vs the f32 reference.
    assert bool(jnp.allclose(out, out_ref, atol=2e-2, rtol=2e-2)), \
        f"case {case_id}: out mismatch (max abs err {out_err:.3e})"
    assert bool(jnp.allclose(corr, corr_ref, atol=2e-3, rtol=2e-3)), \
        f"case {case_id}: corr mismatch (max abs err {corr_err:.3e})"


if __name__ == "__main__":
    base_key = jax.random.PRNGKey(0)
    # Module-default toy sizes (batch=2, input_dim=16, num_groups=4, group_size=4,
    # hidden=16): single grid step (G=4 has no valid sub-block under the (8,128) rule);
    # at these sizes the kernel is overhead-dominated by construction.
    _run_case(base_key, 0, B=2, D=16, G=4, GS=4, H=16)
    # Larger config exercising the pipelined multi-step grid (2 group blocks of 8,
    # GB*H = 128 lane-aligned) and lane-dense (G, B) output stores with B = 128.
    _run_case(base_key, 1, B=128, D=64, G=16, GS=8, H=16, group_block=8)
    print("KERNEL_OK")
</pallas_src>

<mosaic_0001>
module attributes {stable_mosaic.version = 11 : i64} {
  func.func @_selective_group_kernel(%arg0: i32, %arg1: memref<2x16xf32, #tpu.memory_space<vmem>>, %arg2: memref<4x16xf32, #tpu.memory_space<vmem>>, %arg3: memref<16x64xbf16, #tpu.memory_space<vmem>>, %arg4: memref<1x64xf32, #tpu.memory_space<vmem>>, %arg5: memref<1x64xf32, #tpu.memory_space<vmem>>, %arg6: memref<4x1xf32, #tpu.memory_space<vmem>>, %arg7: memref<4x2xf32, #tpu.memory_space<vmem>>, %arg8: memref<4x1xf32, #tpu.memory_space<vmem>>) attributes {dimension_semantics = [#tpu.dimension_semantics<parallel>], iteration_bounds = array<i64: 1>, scalar_prefetch = 0 : i64, scratch_operands = 0 : i64, tpu.core_type = #tpu.core_type<tc>, window_params = [{pipeline_mode = #tpu.pipeline_mode<synchronous>, transform_indices = @transform_0, window_bounds = array<i64: 2, 16>}, {transform_indices = @transform_1, window_bounds = array<i64: 4, 16>}, {transform_indices = @transform_2, window_bounds = array<i64: 16, 64>}, {transform_indices = @transform_3, window_bounds = array<i64: 1, 64>}, {transform_indices = @transform_4, window_bounds = array<i64: 1, 64>}, {transform_indices = @transform_5, window_bounds = array<i64: 4, 1>}, {transform_indices = @transform_6, window_bounds = array<i64: 4, 2>}, {transform_indices = @transform_7, window_bounds = array<i64: 4, 1>}]} {
    %c0 = arith.constant 0 : index
    %c0_0 = arith.constant 0 : index
    %0 = vector.load %arg1[%c0, %c0_0] : memref<2x16xf32, #tpu.memory_space<vmem>>, vector<2x16xf32>
    %c0_1 = arith.constant 0 : index
    %c0_2 = arith.constant 0 : index
    %1 = vector.load %arg2[%c0_1, %c0_2] : memref<4x16xf32, #tpu.memory_space<vmem>>, vector<4x16xf32>
    %2 = tpu.iota {dimensions = array<i32: 1>} : vector<4x64xi32>
    %3 = tpu.iota {dimensions = array<i32: 0>} : vector<4x64xi32>
    %c16_i32 = arith.constant 16 : i32
    %4 = vector.broadcast %c16_i32 : i32 to vector<4x64xi32>
    %5 = arith.muli %3, %4 : vector<4x64xi32>
    %6 = arith.cmpi sge, %2, %5 : vector<4x64xi32>
    %c1_i32 = arith.constant 1 : i32
    %7 = vector.broadcast %c1_i32 : i32 to vector<4x64xi32>
    %8 = arith.addi %3, %7 : vector<4x64xi32>
    %c16_i32_3 = arith.constant 16 : i32
    %9 = vector.broadcast %c16_i32_3 : i32 to vector<4x64xi32>
    %10 = arith.muli %8, %9 : vector<4x64xi32>
    %11 = arith.cmpi slt, %2, %10 : vector<4x64xi32>
    %12 = arith.andi %6, %11 : vector<4x64xi1>
    %13 = arith.extui %12 : vector<4x64xi1> to vector<4x64xi32>
    %14 = arith.sitofp %13 : vector<4x64xi32> to vector<4x64xf32>
    %15 = tpu.transpose %1, [1, 0] : vector<4x16xf32> -> vector<16x4xf32>
    %cst = arith.constant dense<0.000000e+00> : vector<16x64xf32>
    %16 = tpu.matmul %15, %14, %cst {dimension_numbers = #tpu.dot_dimension_numbers<[1], [0], [0], [1], [0, 0, 1, 1], [], []>} : vector<16x4xf32>, vector<4x64xf32>, vector<16x64xf32> -> vector<16x64xf32>
    %c0_4 = arith.constant 0 : index
    %c0_5 = arith.constant 0 : index
    %17 = vector.load %arg3[%c0_4, %c0_5] : memref<16x64xbf16, #tpu.memory_space<vmem>>, vector<16x64xbf16>
    %18 = arith.truncf %16 : vector<16x64xf32> to vector<16x64xbf16>
    %19 = arith.mulf %17, %18 : vector<16x64xbf16>
    %20 = arith.truncf %0 : vector<2x16xf32> to vector<2x16xbf16>
    %cst_6 = arith.constant dense<0.000000e+00> : vector<2x64xf32>
    %21 = tpu.matmul %20, %19, %cst_6 {dimension_numbers = #tpu.dot_dimension_numbers<[1], [0], [0], [1], [0, 0, 1, 1], [], []>} : vector<2x16xbf16>, vector<16x64xbf16>, vector<2x64xf32> -> vector<2x64xf32>
    %c0_7 = arith.constant 0 : index
    %c0_8 = arith.constant 0 : index
    %22 = vector.load %arg4[%c0_7, %c0_8] : memref<1x64xf32, #tpu.memory_space<vmem>>, vector<1x64xf32>
    %23 = vector.broadcast %22 : vector<1x64xf32> to vector<2x64xf32>
    %24 = arith.addf %21, %23 : vector<2x64xf32>
    %cst_9 = arith.constant 0.000000e+00 : f32
    %25 = vector.broadcast %cst_9 : f32 to vector<2x64xf32>
    %26 = arith.maximumf %24, %25 : vector<2x64xf32>
    %c0_10 = arith.constant 0 : index
    %c0_11 = arith.constant 0 : index
    %27 = vector.load %arg5[%c0_10, %c0_11] : memref<1x64xf32, #tpu.memory_space<vmem>>, vector<1x64xf32>
    %28 = vector.broadcast %27 : vector<1x64xf32> to vector<2x64xf32>
    %29 = arith.mulf %26, %28 : vector<2x64xf32>
    %cst_12 = arith.constant dense<0.000000e+00> : vector<4x2xf32>
    %30 = tpu.matmul %14, %29, %cst_12 {dimension_numbers = #tpu.dot_dimension_numbers<[1], [1], [0], [0], [0, 0, 1, 0], [], []>} : vector<4x64xf32>, vector<2x64xf32>, vector<4x2xf32> -> vector<4x2xf32>
    %c0_13 = arith.constant 0 : index
    %c0_14 = arith.constant 0 : index
    %31 = vector.load %arg6[%c0_13, %c0_14] : memref<4x1xf32, #tpu.memory_space<vmem>>, vector<4x1xf32>
    %32 = vector.broadcast %31 : vector<4x1xf32> to vector<4x2xf32>
    %33 = arith.addf %30, %32 : vector<4x2xf32>
    %c0_15 = arith.constant 0 : index
    %c0_16 = arith.constant 0 : index
    %34 = vector.load %arg7[%c0_15, %c0_16] : memref<4x2xf32, #tpu.memory_space<vmem>>, vector<4x2xf32>
    tpu.vector_store %arg7[%c0_15, %c0_16], %33 {strides = array<i32>} : memref<4x2xf32, #tpu.memory_space<vmem>>, vector<4x2xf32>,
    %35 = arith.mulf %0, %0 : vector<2x16xf32>
    %cst_17 = arith.constant dense<0.000000e+00> : vector<16xf32>
    %36 = vector.multi_reduction <add>, %35, %cst_17 [0] : vector<2x16xf32> to vector<16xf32>
    %37 = vector.shape_cast %36 : vector<16xf32> to vector<1x16xf32>
    %38 = vector.broadcast %37 : vector<1x16xf32> to vector<4x16xf32>
    %39 = arith.mulf %1, %38 : vector<4x16xf32>
    %cst_18 = arith.constant 0.000000e+00 : f32
    %40 = vector.broadcast %cst_18 : f32 to vector<4x16xf32>
    %41 = arith.cmpf ogt, %39, %40 : vector<4x16xf32>
    %42 = arith.extui %41 : vector<4x16xi1> to vector<4x16xi32>
    %43 = arith.sitofp %42 : vector<4x16xi32> to vector<4x16xf32>
    %cst_19 = arith.constant dense<0.000000e+00> : vector<4xf32>
    %44 = vector.multi_reduction <add>, %43, %cst_19 [1] : vector<4x16xf32> to vector<4xf32>
    %45 = vector.shape_cast %44 : vector<4xf32> to vector<4x1xf32>
    %cst_20 = arith.constant 1.000000e-30 : f32
    %46 = vector.broadcast %cst_20 : f32 to vector<4x16xf32>
    %47 = arith.maximumf %39, %46 : vector<4x16xf32>
    %48 = math.rsqrt %47 : vector<4x16xf32>
    %49 = arith.mulf %43, %48 : vector<4x16xf32>
    %50 = vector.broadcast %37 : vector<1x16xf32> to vector<4x16xf32>
    %51 = arith.mulf %50, %49 : vector<4x16xf32>
    %52 = arith.mulf %51, %49 : vector<4x16xf32>
    %cst_21 = arith.constant dense<0.000000e+00> : vector<4xf32>
    %53 = vector.multi_reduction <add>, %52, %cst_21 [1] : vector<4x16xf32> to vector<4xf32>
    %54 = vector.shape_cast %53 : vector<4xf32> to vector<4x1xf32>
    %cst_22 = arith.constant dense<0.000000e+00> : vector<4x2xf32>
    %55 = tpu.matmul %49, %0, %cst_22 {dimension_numbers = #tpu.dot_dimension_numbers<[1], [1], [0], [0], [0, 0, 1, 0], [], []>} : vector<4x16xf32>, vector<2x16xf32>, vector<4x2xf32> -> vector<4x2xf32>
    %56 = arith.mulf %55, %55 : vector<4x2xf32>
    %cst_23 = arith.constant dense<0.000000e+00> : vector<4xf32>
    %57 = vector.multi_reduction <add>, %56, %cst_23 [1] : vector<4x2xf32> to vector<4xf32>
    %58 = vector.shape_cast %57 : vector<4xf32> to vector<4x1xf32>
    %59 = arith.subf %58, %54 : vector<4x1xf32>
    %cst_24 = arith.constant 5.000000e-01 : f32
    %60 = vector.broadcast %cst_24 : f32 to vector<4x1xf32>
    %61 = arith.mulf %60, %59 : vector<4x1xf32>
    %cst_25 = arith.constant 5.000000e-01 : f32
    %62 = vector.broadcast %cst_25 : f32 to vector<4x1xf32>
    %63 = arith.mulf %62, %45 : vector<4x1xf32>
    %cst_26 = arith.constant 1.000000e+00 : f32
    %64 = vector.broadcast %cst_26 : f32 to vector<4x1xf32>
    %65 = arith.subf %45, %64 : vector<4x1xf32>
    %66 = arith.mulf %63, %65 : vector<4x1xf32>
    %cst_27 = arith.constant 9.99999997E-7 : f32
    %67 = vector.broadcast %cst_27 : f32 to vector<4x1xf32>
    %68 = arith.addf %66, %67 : vector<4x1xf32>
    %cst_28 = arith.constant 2.000000e+00 : f32
    %69 = vector.broadcast %cst_28 : f32 to vector<4x1xf32>
    %70 = arith.divf %61, %69 : vector<4x1xf32>
    %71 = arith.divf %70, %68 : vector<4x1xf32>
    %cst_29 = arith.constant 2.000000e+00 : f32
    %72 = vector.broadcast %cst_29 : f32 to vector<4x1xf32>
    %73 = arith.cmpf oge, %45, %72 : vector<4x1xf32>
    %cst_30 = arith.constant 0.000000e+00 : f32
    %74 = vector.broadcast %cst_30 : f32 to vector<4x1xf32>
    %75 = arith.select %73, %71, %74 : vector<4x1xi1>, vector<4x1xf32>
    %c0_31 = arith.constant 0 : index
    %c0_32 = arith.constant 0 : index
    %76 = vector.load %arg8[%c0_31, %c0_32] : memref<4x1xf32, #tpu.memory_space<vmem>>, vector<4x1xf32>
    tpu.vector_store %arg8[%c0_31, %c0_32], %75 {strides = array<i32>} : memref<4x1xf32, #tpu.memory_space<vmem>>, vector<4x1xf32>,
    return
  }
  func.func @transform_0(%arg0: i32) -> (i32, i32) {
    %c0_i32 = arith.constant 0 : i32
    %c0_i32_0 = arith.constant 0 : i32
    %c0_i32_1 = arith.constant 0 : i32
    return %c0_i32, %c0_i32_0 : i32, i32
  }
  func.func @transform_1(%arg0: i32) -> (i32, i32) {
    %c0_i32 = arith.constant 0 : i32
    %c0_i32_0 = arith.constant 0 : i32
    return %arg0, %c0_i32 : i32, i32
  }
  func.func @transform_2(%arg0: i32) -> (i32, i32) {
    %c0_i32 = arith.constant 0 : i32
    %c0_i32_0 = arith.constant 0 : i32
    return %c0_i32, %arg0 : i32, i32
  }
  func.func @transform_3(%arg0: i32) -> (i32, i32) {
    %c0_i32 = arith.constant 0 : i32
    %c0_i32_0 = arith.constant 0 : i32
    return %c0_i32, %arg0 : i32, i32
  }
  func.func @transform_4(%arg0: i32) -> (i32, i32) {
    %c0_i32 = arith.constant 0 : i32
    %c0_i32_0 = arith.constant 0 : i32
    return %c0_i32, %arg0 : i32, i32
  }
  func.func @transform_5(%arg0: i32) -> (i32, i32) {
    %c0_i32 = arith.constant 0 : i32
    %c0_i32_0 = arith.constant 0 : i32
    return %arg0, %c0_i32 : i32, i32
  }
  func.func @transform_6(%arg0: i32) -> (i32, i32) {
    %c0_i32 = arith.constant 0 : i32
    %c0_i32_0 = arith.constant 0 : i32
    return %arg0, %c0_i32 : i32, i32
  }
  func.func @transform_7(%arg0: i32) -> (i32, i32) {
    %c0_i32 = arith.constant 0 : i32
    %c0_i32_0 = arith.constant 0 : i32
    return %arg0, %c0_i32 : i32, i32
  }
}

</mosaic_0001>

<bundles_post_ra>
// kernel: tpu_custom_call.1
= control target key start
LH: loop header
LB: loop body
LE: loop exit
PB: predicated region body
PF: predicated region fallthrough
CT: control target
= control target key end

     0   :  { %13 = vsyncpa [#allocation3], 0  ;;  %s487_s0 = inlined_call_operand.hbm [shape: f32[2,16], index: 0, kind: input, shape index: {}]   ;;  %s488_s1 = inlined_call_operand.vmem [shape: f32[4,16], index: 1, kind: input, shape index: {}]   ;;  %s489_s2 = inlined_call_operand.hbm [shape: bf16[16,64], index: 2, kind: input, shape index: {}]   ;;  %s490_s3 = inlined_call_operand.vmem [shape: f32[1,64], index: 3, kind: input, shape index: {}]   ;;  %s491_s4 = inlined_call_operand.vmem [shape: f32[1,64], index: 4, kind: input, shape index: {}]   ;;  %s492_s5 = inlined_call_operand.vmem [shape: f32[4,1], index: 5, kind: input, shape index: {}]   ;;  %s493_s6 = inlined_call_operand.vmem [shape: f32[4,2], index: 6, kind: output, shape index: {0}]   ;;  %s494_s7 = inlined_call_operand.vmem [shape: f32[4,1], index: 7, kind: output, shape index: {1}]  }
   0x1   :  { %s20_s26 = sshll.u32 %s487_s0, 4  ;;  %s21_s26 = int_to_ptr.hbm [resolvable:$true] %s20_s26 }
   0x2   :  { %14 = vsyncpa [#allocation5], 0  ;;  %s400_s27 = smov [#allocation2]   ;;  %s32_s8 = sshll.u32 %s489_s2, 4  ;;  %s33_s8 = int_to_ptr.hbm [resolvable:$true] %s32_s8 }
   0x3   :  { %s22_s28 = sshll.u32 %s400_s27, 4  ;;  %s401_s9 = smov [#allocation4]   ;;  %s23_s28 = int_to_ptr.vmem [resolvable:$true] %s22_s28 }
   0x4   :  { %25 = dma.hbm_to_vmem [thread:$0]  %s21_s26, 32, %s23_s28, [#allocation3]  }
   0x5   :  { %s34_s10 = sshll.u32 %s401_s9, 4  ;;  %s402_s11 = smov 64   ;;  %s35_s10 = int_to_ptr.vmem [resolvable:$true] %s34_s10 }
   0x6   :  { %s403_s12 = smov 4  }
   0x7   :  { %40 = dma.hbm_to_vmem [thread:$0]  %s33_s8, 128, %s35_s10, [#allocation5], %s402_s11, %s402_s11, %s403_s12  }
   0x8   :  { %396 = dma.done.wait [#allocation3], 32  }
   0x9   :  { %397 = vsyncadd [#allocation3], 4294967264 }
   0xa   :  { %398 = dma.done.wait [#allocation5], 128  }
   0xb   :  { %399 = vsyncadd [#allocation5], 4294967168  ;;  %vm210_vm0 = vcmask 123904   ;;  %v58_v0 = vlaneseq  ;;  %v57_v1 = vld [vmem:[%s488_s1] sm:$0xf]  ;;  %vm109_vm3 = vcmask 1043456  }
   0xc   :  { %v456_v2 = vld [vmem:[#allocation2] sm:$0x3]  ;;  %70 = vxpose.xlu0.b32.start.end [1/1] (short) (narrow) %v57_v1, 16  ;;  %v404_v13 = vmov 0.0   ;;  %vm102_vm9 = vcmask 31744   ;;  %vm152_vm10 = vcmask 130048  }
   0xd   :  { %v209_v3 = vmul.f32 %v456_v2, %v456_v2  ;;  %v59_v4 = vand.u32 127, %v58_v0  ;;  %v61_v5 = vshrl.u32 %v58_v0, 7  ;;  %324 = vmatpush.xpose.msk.msra.mxu3 %vm152_vm10, %v456_v2  ;;  %vm222_vm11 = vcmask 125952   ;;  %v328_v37 = vld [vmem:[#allocation4] sm:$0xff]   ;;  %v340_v53 = vld [vmem:[%s490_s3] ss:$0 sm:$0xff] }
   0xe   :  { %v329_v41 = vunpack.c.l.bf16 %v328_v37  ;;  %v330_v42 = vunpack.c.h.bf16 %v328_v37  ;;  %v147_v47 = vpack.c.bf16 %v456_v2, %v456_v2  ;;  %vm207_vm12 = vcmask 11264   ;;  %v175_v51 = vld [vmem:[%s492_s5] sm:$0xf] }
   0xf   :  { %v211_v6 = vsel %vm210_vm0, %v209_v3, 0.0  ;;  %v62_v7 = vmul.u32 16, %v61_v5  ;;  %v64_v8 = vadd.s32 1, %v61_v5  ;;  %v405_v52 = vmov 0   ;;  %v341_v56 = vld [vmem:[%s491_s4] ss:$0 sm:$0xff] }
  0x10   :  { %v212_v9 = vrot.slane %v211_v6, 4  ;;  %338 = vset.pattern.permute.xlu2 %v405_v52  ;;  %vm181_vm13 = vcmask 523264  }
  0x11   :  { %vm63_vm1 = vcmp.ge.s32.totalorder %v59_v4, %v62_v7  ;;  %v65_v10 = vmul.u32 16, %v64_v8  ;;  %178 = vperm.xlu2 %338, %v175_v51  }
  0x12   :  { %v213_v11 = vadd.f32 %v212_v9, %v211_v6 }
  0x13   :  { %vm66_vm2 = vcmp.lt.s32.totalorder %v59_v4, %v65_v10 }
  0x14   :  { %v214_v12 = vrot.slane %v213_v11, 2  ;;  %vm67_vm4 = vmand %vm63_vm1, %vm66_vm2 }
  0x15   :  { %v460_v14 = vsel %vm67_vm4, 1.0, %v404_v13  ;;  %vm304_vm4 = vcmask 3072  }
  0x16   :  { %v215_v15 = vadd.f32 %v214_v12, %v213_v11  ;;  %317 = vmatpush.msk.msra.mxu0 %vm109_vm3, %v460_v14 }
  0x18   :  { %v216_v16 = vrot.slane %v215_v15, 1 }
  0x1a   :  { %v217_v17 = vadd.f32 %v216_v16, %v215_v15 }
  0x1c   :  { %v218_v18 = vmul.f32 %v217_v17, %v57_v1  ;;  %v406_v1 = vmov 2.0  }
  0x1e   :  { %v226_v19 = vmax.f32 %v218_v18, 1e-30  ;;  %vm219_vm5 = vcmp.gt.f32.partialorder %v218_v18, 0.0 }
  0x1f   :  { %v323_v20 = vsel %vm219_vm5, 1.0, %v404_v13 }
  0x20   :  { %342 = vrsqrt.f32 %v226_v19  ;;  %vm233_vm6 = vweird.f32 %v226_v19  ;;  %v223_v32 = vsel %vm222_vm11, %v323_v20, 0.0 }
  0x26   :  { %v343_v21 = vpop.eup %342 }
  0x27   :  { %v228_v22 = vmul.f32 %v343_v21, %v226_v19  ;;  %vm234_vm7 = vweird.f32 %v343_v21 }
  0x28   :  { %vm235_vm8 = vmor %vm233_vm6, %vm234_vm7 }
  0x29   :  { %v229_v23 = vmul.f32 %v343_v21, %v228_v22 }
  0x2b   :  { %v230_v24 = vmul.f32 0.5, %v229_v23 }
  0x2d   :  { %v231_v25 = vsub.f32 1.5, %v230_v24 }
  0x2f   :  { %v232_v26 = vmul.f32 %v343_v21, %v231_v25 }
  0x31   :  { %v236_v27 = vsel %vm235_vm8, %v343_v21, %v232_v26 }
  0x32   :  { %v237_v28 = vmul.f32 %v323_v20, %v236_v27 }
  0x34   :  { %325 = vmatmul.msk.f32.vlgmr.msra.gmra.mxu3 %vm152_vm10, %v237_v28  ;;  %v238_v31 = vmul.f32 %v237_v28, %v217_v17 }
  0x36   :  { %v239_v33 = vmul.f32 %v238_v31, %v237_v28 }
  0x38   :  { %v240_v34 = vsel %vm222_vm11, %v239_v33, 0.0 }
  0x39   :  { %241 = vadd.xlane.f32.xlu1 %v240_v34 }
  0x6b   :  { %v179_v25 = vpop.permute.xlu2 %178 }
  0x73   :  { %339 = vset.pattern.permute.xlu0 %v405_v52 }
  0x85   :  { %224 = vadd.xlane.f32.xlu0 %v223_v32 }
  0xac   :  { %v242_v7 = vpop.xlane.xlu1 %241 }
  0xb0   :  { %v86_v29 = vpop.trf.xlu0 }
  0xb1   :  { %318 = vmatmul.msk.f32.vlgmr.msra.gmra.mxu0 %vm102_vm9, %v86_v29 }
  0xb7   :  { %v266_v48 = vpop.f32.mrf.mxu3 }
  0xb8   :  { %v87_v30 = vpop.trf.xlu0  ;;  %v269_v49 = vmul.f32 %v266_v48, %v266_v48 }
  0xb9   :  { %319 = vmatmul.msk.f32.gmra.mxu0 %vm102_vm9, %v87_v30 }
  0xba   :  { %v270_v50 = vsel %vm207_vm12, %v269_v49, 0.0 }
  0xbb   :  { %271 = vadd.xlane.f32.xlu1 %v270_v50 }
  0xf8   :  { %v225_v60 = vpop.xlane.xlu0 %224 }
  0xf9   :  { %v275_v61 = vmul.f32 0.5, %v225_v60  ;;  %v326_v62 = vadd.f32 -1.0, %v225_v60  ;;  %vm302_vm3 = vcmp.ge.f32.partialorder %v225_v60, 2.0 }
  0xfb   :  { %v277_v63 = vmul.f32 %v326_v62, %v275_v61 }
  0xfd   :  { %v278_v0 = vadd.f32 1e-06, %v277_v63 }
  0xff   :  { %344 = vrcp.f32 %v278_v0  ;;  %vm292_vm14 = vweird.f32 %v278_v0  ;;  %v298_v11 = vand.u32 2147483648, %v278_v0  ;;  %v296_v13 = vand.u32 2147483647, %v278_v0 }
 0x100   :  { %346 = vrcp.f32 %v406_v1 }
 0x101   :  { %v299_v16 = vor.u32 1.1754944e-38, %v298_v11  ;;  %vm297_vm2 = vcmp.eq.f32.partialorder %v296_v13, 8.507059e+37 }
 0x105   :  { %v345_v2 = vpop.eup %344 }
 0x106   :  { %v347_v3 = vpop.eup %346  ;;  %v288_v4 = vmul.f32 %v345_v2, %v278_v0  ;;  %vm293_vm15 = vweird.f32 %v345_v2 }
 0x107   :  { %v280_v5 = vmul.f32 2.0, %v347_v3  ;;  %vm294_vm0 = vmor %vm292_vm14, %vm293_vm15  ;;  %vm284_vm1 = vweird.f32 %v347_v3 }
 0x108   :  { %v289_v6 = vsub.f32 1.0, %v288_v4 }
 0x109   :  { %v281_v8 = vsub.f32 1.0, %v280_v5 }
 0x10a   :  { %v290_v9 = vmul.f32 %v345_v2, %v289_v6 }
 0x10b   :  { %v282_v10 = vmul.f32 %v347_v3, %v281_v8 }
 0x10c   :  { %v291_v12 = vadd.f32 %v345_v2, %v290_v9 }
 0x10e   :  { %v295_v18 = vsel %vm294_vm0, %v345_v2, %v291_v12 }
 0x10f   :  { %v300_v21 = vsel %vm297_vm2, %v299_v16, %v295_v18 }
 0x12e   :  { %v130_v35 = vpop.f32.mrf.mxu0  ;;  %v272_v15 = vpop.xlane.xlu1 %271 }
 0x12f   :  { %v138_v36 = vpack.c.bf16 %v130_v35, %v130_v35  ;;  %v273_v17 = vsub.f32 %v272_v15, %v242_v7 }
 0x131   :  { %v142_v39 = vunpack.c.l.bf16 %v138_v36  ;;  %v274_v20 = vmul.f32 0.5, %v273_v17 }
 0x133   :  { %v144_v44 = vmul.f32 %v329_v41, %v142_v39 }
 0x136   :  { %v133_v38 = vpop.f32.mrf.mxu0 }
 0x137   :  { %v139_v40 = vpack.c.bf16 %v133_v38, %v133_v38 }
 0x139   :  { %v143_v43 = vunpack.c.l.bf16 %v139_v40 }
 0x13b   :  { %v145_v45 = vmul.f32 %v330_v42, %v143_v43 }
 0x13d   :  { %v146_v46 = vpack.c.bf16 %v145_v45, %v144_v44 }
 0x13f   :  { %163 = vmatpush.bf16.msra.mxu1 %v146_v46 }
 0x142   :  { %320 = vmatmul.msk.bf16.vlgmr.msra.gmra.mxu1 %vm152_vm10, %v147_v47 }
 0x1bf   :  { %v165_v54 = vpop.f32.mrf.mxu1 }
 0x1c0   :  { %v166_v55 = vadd.f32 %v340_v53, %v165_v54 }
 0x1c2   :  { %v169_v57 = vmax.f32 %v166_v55, 0.0 }
 0x1c4   :  { %v174_v58 = vmul.f32 %v341_v56, %v169_v57 }
 0x1c6   :  { %321 = vmatpush.xpose.msk.msra.mxu2 %vm181_vm13, %v174_v58 }
 0x1c7   :  { %v167_v59 = vpop.f32.mrf.mxu1 }
 0x1c9   :  { %322 = vmatmul.msk.f32.vlgmr.msra.gmra.mxu2 %vm181_vm13, %v460_v14  ;;  %v283_v14 = vadd.f32 %v347_v3, %v282_v10 }
 0x1cb   :  { %v285_v19 = vsel %vm284_vm1, %v347_v3, %v283_v14 }
 0x1cc   :  { %v286_v22 = vmul.f32 %v285_v19, %v274_v20 }
 0x1ce   :  { %v301_v23 = vmul.f32 %v300_v21, %v286_v22 }
 0x1d0   :  { %v303_v24 = vsel %vm302_vm3, %v301_v23, 0.0 }
 0x1d1   :  { %305 = vst.msk [vmem:[%s494_s7] sm:$0xf] %vm304_vm4, %v303_v24 }
 0x24c   :  { %v204_v26 = vpop.f32.mrf.mxu2 }
 0x24d   :  { %v205_v27 = vadd.f32 %v204_v26, %v179_v25 }
 0x24f   :  { %208 = vst.msk [vmem:[%s493_s6] sm:$0xf] %vm207_vm12, %v205_v27 }
 0x250   :  { %314 = vsyncpa [#allocation3], 1 }
 0x251   :  { %315 = vsyncpa [#allocation5], 1 }

</bundles_post_ra>
